<compile_context>
chip_gen: v5e
topology: v5e:2x2
jax: 0.10.0
libtpu: 0.0.40
codegen_flags: <defaults>
</compile_context>

<pallas_src>
import jax
import jax.numpy as jnp
from jax.experimental import pallas as pl
from jax.experimental.pallas import tpu as pltpu


def _awgn_kernel(p_ref, x_ref, n_ref, o_ref):
    # p is a runtime scalar; broadcast is hoisted once per tile.
    p = p_ref[0, 0]
    x = x_ref[...].astype(jnp.float32)
    n = n_ref[...]
    o_ref[...] = (x + p * n).astype(o_ref.dtype)


def _add_scaled_noise(x, p, noise):
    """Pallas-fused out = x + p * noise over a lane-dense tiled 2-D slab."""
    orig_shape = x.shape
    orig_dtype = x.dtype
    total = x.size

    # Lane-dense layout: last dim a multiple of 128 (1024 when possible).
    lane = 1024 if total >= 1024 else 128
    rows = pl.cdiv(total, lane)

    tm_max = 512  # 512 x 1024 f32 = 2 MiB per operand tile
    if rows <= tm_max:
        tm = rows                      # full-extent block (always legal)
        rows_padded = rows
    else:
        tm = tm_max                    # multiple of 8 -> legal sublane tiling
        rows_padded = pl.cdiv(rows, tm) * tm

    padded_total = rows_padded * lane
    pad = padded_total - total

    xf = jnp.pad(x.reshape(-1), (0, pad)).reshape(rows_padded, lane)
    nf = jnp.pad(noise.reshape(-1).astype(jnp.float32), (0, pad)).reshape(
        rows_padded, lane
    )
    p_arr = jnp.full((1, 1), p, dtype=jnp.float32)

    grid = (rows_padded // tm,)
    out_itemsize = jnp.dtype(orig_dtype).itemsize
    cost = pl.CostEstimate(
        flops=2 * padded_total,
        transcendentals=0,
        bytes_accessed=(
            padded_total * xf.dtype.itemsize      # x read
            + padded_total * 4                    # noise read (f32)
            + padded_total * out_itemsize         # out write
        ),
    )

    out2 = pl.pallas_call(
        _awgn_kernel,
        out_shape=jax.ShapeDtypeStruct((rows_padded, lane), orig_dtype),
        grid=grid,
        in_specs=[
            pl.BlockSpec((1, 1), lambda i: (0, 0)),        # p (runtime scalar)
            pl.BlockSpec((tm, lane), lambda i: (i, 0)),    # x tile
            pl.BlockSpec((tm, lane), lambda i: (i, 0)),    # noise tile
        ],
        out_specs=pl.BlockSpec((tm, lane), lambda i: (i, 0)),
        compiler_params=pltpu.CompilerParams(
            dimension_semantics=("parallel",),             # megacore-shardable
            vmem_limit_bytes=32 * 1024 * 1024,             # fits v5e/v6e/v7x
        ),
        cost_estimate=cost,
    )(p_arr, xf, nf)

    return out2.reshape(-1)[:total].reshape(orig_shape)


def awgn_channel(x, p, key):
    """out = x + p * N(0, 1) noise; matches AWNGChannel.forward."""
    noise = jax.random.normal(key, x.shape, dtype=jnp.float32)
    return _add_scaled_noise(x, p, noise)


if __name__ == "__main__":
    key = jax.random.PRNGKey(0)
    kx, kn = jax.random.split(key)

    N, C, H, W = 2, 4, 16, 16
    x = jax.random.normal(kx, (N, C, H, W), dtype=jnp.float32)
    p = 0.1

    out = awgn_channel(x, p, kn)
    out = jax.block_until_ready(out)

    # Shape / dtype preserved.
    assert out.shape == x.shape and out.dtype == x.dtype

    # Exact reference: same key/shape/dtype reproduces the same noise draw.
    noise_ref = jax.random.normal(kn, x.shape, dtype=jnp.float32)
    ref = (x.astype(jnp.float32) + jnp.float32(p) * noise_ref).astype(x.dtype)
    assert jnp.allclose(out, ref, rtol=1e-6, atol=1e-6), "mismatch vs reference"

    # Statistical sanity: noise is finite and scaled ~p.
    noise = out - x
    assert bool(jnp.all(jnp.isfinite(noise)))
    noise_std = float(jnp.std(noise))
    assert 0.05 < noise_std < 0.2, f"unexpected noise std {noise_std}"

    print("KERNEL_OK")
</pallas_src>

<mosaic_0001>
module attributes {stable_mosaic.version = 11 : i64} {
  func.func @_awgn_kernel(%arg0: i32, %arg1: memref<1x1xf32, #tpu.memory_space<vmem>>, %arg2: memref<2x1024xf32, #tpu.memory_space<vmem>>, %arg3: memref<2x1024xf32, #tpu.memory_space<vmem>>, %arg4: memref<2x1024xf32, #tpu.memory_space<vmem>>) attributes {dimension_semantics = [#tpu.dimension_semantics<parallel>], iteration_bounds = array<i64: 1>, scalar_prefetch = 0 : i64, scratch_operands = 0 : i64, tpu.core_type = #tpu.core_type<tc>, window_params = [{pipeline_mode = #tpu.pipeline_mode<synchronous>, transform_indices = @transform_0, window_bounds = array<i64: 1, 1>}, {transform_indices = @transform_1, window_bounds = array<i64: 2, 1024>}, {transform_indices = @transform_2, window_bounds = array<i64: 2, 1024>}, {transform_indices = @transform_3, window_bounds = array<i64: 2, 1024>}]} {
    %c0 = arith.constant 0 : index
    %c0_0 = arith.constant 0 : index
    %0 = vector.load %arg1[%c0, %c0_0] : memref<1x1xf32, #tpu.memory_space<vmem>>, vector<1x1xf32>
    %1 = vector.extract %0[0, 0] : f32 from vector<1x1xf32>
    %c0_1 = arith.constant 0 : index
    %c0_2 = arith.constant 0 : index
    %2 = vector.load %arg2[%c0_1, %c0_2] : memref<2x1024xf32, #tpu.memory_space<vmem>>, vector<2x1024xf32>
    %c0_3 = arith.constant 0 : index
    %c0_4 = arith.constant 0 : index
    %3 = vector.load %arg3[%c0_3, %c0_4] : memref<2x1024xf32, #tpu.memory_space<vmem>>, vector<2x1024xf32>
    %4 = vector.broadcast %1 : f32 to vector<2x1024xf32>
    %5 = arith.mulf %4, %3 : vector<2x1024xf32>
    %6 = arith.addf %2, %5 : vector<2x1024xf32>
    %c0_5 = arith.constant 0 : index
    %c0_6 = arith.constant 0 : index
    %7 = vector.load %arg4[%c0_5, %c0_6] : memref<2x1024xf32, #tpu.memory_space<vmem>>, vector<2x1024xf32>
    tpu.vector_store %arg4[%c0_5, %c0_6], %6 {strides = array<i32>} : memref<2x1024xf32, #tpu.memory_space<vmem>>, vector<2x1024xf32>,
    return
  }
  func.func @transform_0(%arg0: i32) -> (i32, i32) {
    %c0_i32 = arith.constant 0 : i32
    %c0_i32_0 = arith.constant 0 : i32
    %c0_i32_1 = arith.constant 0 : i32
    return %c0_i32, %c0_i32_0 : i32, i32
  }
  func.func @transform_1(%arg0: i32) -> (i32, i32) {
    %c0_i32 = arith.constant 0 : i32
    %c0_i32_0 = arith.constant 0 : i32
    return %arg0, %c0_i32 : i32, i32
  }
  func.func @transform_2(%arg0: i32) -> (i32, i32) {
    %c0_i32 = arith.constant 0 : i32
    %c0_i32_0 = arith.constant 0 : i32
    return %arg0, %c0_i32 : i32, i32
  }
  func.func @transform_3(%arg0: i32) -> (i32, i32) {
    %c0_i32 = arith.constant 0 : i32
    %c0_i32_0 = arith.constant 0 : i32
    return %arg0, %c0_i32 : i32, i32
  }
}

</mosaic_0001>

<bundles_post_ra>
// kernel: tpu_custom_call.1
= control target key start
LH: loop header
LB: loop body
LE: loop exit
PB: predicated region body
PF: predicated region fallthrough
CT: control target
= control target key end

     0   :  { %s194_s0 = inlined_call_operand.<no memory space> [shape: f32[1,1], index: 0, kind: input, shape index: {}]   ;;  %s195_s1 = inlined_call_operand.hbm [shape: f32[2,1024], index: 1, kind: input, shape index: {}]   ;;  %s196_s2 = inlined_call_operand.hbm [shape: f32[2,1024], index: 2, kind: input, shape index: {}]   ;;  %s197_s3 = inlined_call_operand.hbm [shape: f32[2,1024], index: 3, kind: output, shape index: {}]  }
   0x1   :  { %v8_v0 = vstv %s194_s0 }
   0x2   :  { %9 = vst [vmem:[#allocation2] sm:$0x1] %v8_v0 }
   0x3   :  { %10 = vsyncpa [#allocation4], 0 }
   0x4   :  { %11 = vsyncpa [#allocation7], 0 }
   0x5   :  { %12 = vsyncpa [#allocation5], 0  ;;  %s20_s16 = sshll.u32 %s195_s1, 4  ;;  %s159_s17 = smov [#allocation3]   ;;  %s21_s16 = int_to_ptr.hbm [resolvable:$true] %s20_s16 }
   0x6   :  { %s22_s18 = sshll.u32 %s159_s17, 4  ;;  %s31_s21 = sshll.u32 %s196_s2, 4  ;;  %s23_s18 = int_to_ptr.vmem [resolvable:$true] %s22_s18  ;;  %s32_s21 = int_to_ptr.hbm [resolvable:$true] %s31_s21 }
   0x7   :  { %25 = dma.hbm_to_vmem [thread:$0]  %s21_s16, 256, %s23_s18, [#allocation4]  }
   0x8   :  { %s160_s22 = smov [#allocation6]  }
   0x9   :  { %s33_s0 = sshll.u32 %s160_s22, 4  ;;  %s34_s0 = int_to_ptr.vmem [resolvable:$true] %s33_s0 }
   0xa   :  { %36 = dma.hbm_to_vmem [thread:$0]  %s32_s21, 256, %s34_s0, [#allocation7]  }
   0xb   :  { %153 = dma.done.wait [#allocation4], 256  }
   0xc   :  { %154 = vsyncadd [#allocation4], 4294967040 }
   0xd   :  { %155 = dma.done.wait [#allocation7], 256  }
   0xe   :  { %156 = vsyncadd [#allocation7], 4294967040  ;;  %v45_v1 = vld [vmem:[#allocation2] sm:$0x1]  ;;  %v49_v2 = vld [vmem:[#allocation6] sm:$0xff]  ;;  %s161_s2 = smov [#allocation8]  }
   0xf   :  { %76 = vpush %v45_v1  ;;  %v50_v3 = vld [vmem:[#allocation6 + $0x8] sm:$0xff]  ;;  %v47_v4 = vld [vmem:[#allocation3] sm:$0xff]  ;;  %v48_v5 = vld [vmem:[#allocation3 + $0x8] sm:$0xff]  ;;  %s63_s23 = sshll.u32 %s161_s2, 4  ;;  %s65_s26 = sshll.u32 %s197_s3, 4  ;;  %s64_s23 = int_to_ptr.vmem [resolvable:$true] %s63_s23  ;;  %s66_s26 = int_to_ptr.hbm [resolvable:$true] %s65_s26 }
  0x40   :  { %s77_s1 = spop %76 }
  0x41   :  { %v51_v6 = vstv %s77_s1 }
  0x42   :  { %v52_v7 = vmul.f32 %v51_v6, %v49_v2  ;;  %v53_v8 = vmul.f32 %v51_v6, %v50_v3 }
  0x44   :  { %v54_v9 = vadd.f32 %v52_v7, %v47_v4  ;;  %v55_v10 = vadd.f32 %v53_v8, %v48_v5 }
  0x46   :  { %56 = vst [vmem:[#allocation8] sm:$0xff] %v54_v9 }
  0x47   :  { %57 = vst [vmem:[#allocation8 + $0x8] sm:$0xff] %v55_v10 }
  0x48   :  { %68 = dma.vmem_to_hbm [thread:$0]  %s64_s23, 256, %s66_s26, [#allocation5]  }
  0x49   :  { %157 = dma.done.wait [#allocation5], 256  }
  0x4a   :  { %158 = vsyncadd [#allocation5], 4294967040 }
  0x4b   :  { %73 = vsyncpa [#allocation4], 1 }
  0x4c   :  { %74 = vsyncpa [#allocation7], 1 }
  0x4d   :  { %75 = vsyncpa [#allocation5], 1 }

</bundles_post_ra>
